<compile_context>
chip_gen: v6e
topology: v6e:2x2x1
jax: 0.10.0
libtpu: 0.0.40
codegen_flags: <defaults>
</compile_context>

<pallas_src>
import functools

import jax
import jax.numpy as jnp
from jax.experimental import pallas as pl
from jax.experimental.pallas import tpu as pltpu


def _shift_rows_reflect(x, ds, lane, H, W):
    """Row shift by ds in {-1,0,+1} with reflection, on a lane-dense (C, H*W) map."""
    if ds == 0:
        return x
    HW = H * W
    fwd = pltpu.roll(x, shift=W, axis=1)        # fwd[p] = x[p - W]  (row h-1)
    bwd = pltpu.roll(x, shift=HW - W, axis=1)   # bwd[p] = x[p + W]  (row h+1)
    if ds == -1:
        # tap[h] = x[h-1]; reflected at h == 0 -> x[1]
        return jnp.where(lane < W, bwd, fwd)
    # ds == +1: tap[h] = x[h+1]; reflected at h == H-1 -> x[H-2]
    return jnp.where(lane >= (H - 1) * W, fwd, bwd)


def _shift_cols_reflect(x, ds, col, H, W):
    """Column shift by ds in {-1,0,+1} with reflection, on a lane-dense (C, H*W) map."""
    if ds == 0:
        return x
    HW = H * W
    fwd = pltpu.roll(x, shift=1, axis=1)        # fwd[p] = x[p - 1]  (col w-1)
    bwd = pltpu.roll(x, shift=HW - 1, axis=1)   # bwd[p] = x[p + 1]  (col w+1)
    if ds == -1:
        # tap[w] = x[w-1]; reflected at w == 0 -> x[1]
        return jnp.where(col == 0, bwd, fwd)
    # ds == +1: tap[w] = x[w+1]; reflected at w == W-1 -> x[W-2]
    return jnp.where(col == W - 1, fwd, bwd)


def resblock_kernel(x_ref, w1_ref, b1_ref, w2_ref, b2_ref, o_ref,
                    *, C, H, W, dot_dtype):
    eps = 1e-5
    HW = H * W

    x = x_ref[0].astype(jnp.float32)                               # (C, HW)
    lane = jax.lax.broadcasted_iota(jnp.int32, (C, HW), 1)         # flat pos
    col = lane % W                                                  # w index

    def conv3x3(a, w_ref, b_ref):
        # a: (C_in, HW) f32;  w_ref: (9, C_out, C_in);  b_ref: (C_out, 1)
        acc = None
        for dy in range(3):
            ah = _shift_rows_reflect(a, dy - 1, lane, H, W)
            for dx in range(3):
                tap = _shift_cols_reflect(ah, dx - 1, col, H, W)
                wt = w_ref[dy * 3 + dx]                             # (C, C)
                part = jnp.dot(wt.astype(dot_dtype), tap.astype(dot_dtype),
                               preferred_element_type=jnp.float32)  # MXU
                acc = part if acc is None else acc + part
        return acc + b_ref[...]                                     # bias once

    def instance_norm(a, relu):
        mu = jnp.mean(a, axis=1, keepdims=True)                     # (C, 1)
        var = jnp.mean((a - mu) * (a - mu), axis=1, keepdims=True)  # biased
        out = (a - mu) * jax.lax.rsqrt(var + eps)
        if relu:
            out = jnp.maximum(out, 0.0)
        return out

    y = instance_norm(conv3x3(x, w1_ref, b1_ref), relu=True)
    y = instance_norm(conv3x3(y, w2_ref, b2_ref), relu=False)
    o_ref[0] = (x + y).astype(o_ref.dtype)                          # residual


def resblock_pallas(x, w1, b1, w2, b2, *, dot_dtype=jnp.float32):
    B, C, H, W = x.shape
    HW = H * W

    # Pad channels to a multiple of 8 (sublane tile) for aligned matmuls.
    # Padded channels are zero everywhere (zero weights/bias -> conv 0,
    # norm of 0 is 0, residual 0) and are sliced off at the end.
    Cp = max(8, ((C + 7) // 8) * 8)
    pc = Cp - C
    xp = jnp.pad(x, ((0, 0), (0, pc), (0, 0), (0, 0)))
    w1p = jnp.pad(w1, ((0, pc), (0, pc), (0, 0), (0, 0)))
    w2p = jnp.pad(w2, ((0, pc), (0, pc), (0, 0), (0, 0)))
    b1p = jnp.pad(b1, ((0, pc),))
    b2p = jnp.pad(b2, ((0, pc),))

    # Lane-dense activations; weights as (9, C_out, C_in) per-tap matrices.
    x2d = xp.reshape(B, Cp, HW)
    w1t = jnp.transpose(w1p, (2, 3, 0, 1)).reshape(9, Cp, Cp)
    w2t = jnp.transpose(w2p, (2, 3, 0, 1)).reshape(9, Cp, Cp)
    b1c = b1p.reshape(Cp, 1)
    b2c = b2p.reshape(Cp, 1)

    kernel = functools.partial(resblock_kernel, C=Cp, H=H, W=W,
                               dot_dtype=dot_dtype)

    out2d = pl.pallas_call(
        kernel,
        out_shape=jax.ShapeDtypeStruct((B, Cp, HW), x.dtype),
        grid=(B,),
        in_specs=[
            pl.BlockSpec((1, Cp, HW), lambda b: (b, 0, 0)),     # x (lane-dense)
            pl.BlockSpec((9, Cp, Cp), lambda b: (0, 0, 0)),     # w1 (resident VMEM)
            pl.BlockSpec((Cp, 1), lambda b: (0, 0)),            # b1
            pl.BlockSpec((9, Cp, Cp), lambda b: (0, 0, 0)),     # w2
            pl.BlockSpec((Cp, 1), lambda b: (0, 0)),            # b2
        ],
        out_specs=pl.BlockSpec((1, Cp, HW), lambda b: (b, 0, 0)),
        compiler_params=pltpu.CompilerParams(
            dimension_semantics=("parallel",)),                 # batch across TCs
    )(x2d, w1t, b1c, w2t, b2c)

    return out2d[:, :C, :].reshape(B, C, H, W)


def resblock_reference(x, w1, b1, w2, b2):
    """Pure-JAX reference matching PyTorch semantics (for verification)."""
    eps = 1e-5

    def pad(a):
        return jnp.pad(a, ((0, 0), (0, 0), (1, 1), (1, 1)), mode="reflect")

    def conv(a, w, b):
        y = jax.lax.conv_general_dilated(
            a, w, window_strides=(1, 1), padding="VALID",
            dimension_numbers=("NCHW", "OIHW", "NCHW"))
        return y + b[None, :, None, None]

    def inorm(a):
        mu = jnp.mean(a, axis=(2, 3), keepdims=True)
        var = jnp.mean((a - mu) ** 2, axis=(2, 3), keepdims=True)
        return (a - mu) * jax.lax.rsqrt(var + eps)

    y = inorm(conv(pad(x), w1, b1))
    y = jnp.maximum(y, 0.0)
    y = inorm(conv(pad(y), w2, b2))
    return x + y


if __name__ == "__main__":
    B, C, H, W = 2, 4, 16, 16

    key = jax.random.PRNGKey(0)
    kx, kw1, kb1, kw2, kb2 = jax.random.split(key, 5)
    x = jax.random.normal(kx, (B, C, H, W), dtype=jnp.float32)
    w1 = jax.random.normal(kw1, (C, C, 3, 3), dtype=jnp.float32) * 0.2
    b1 = jax.random.normal(kb1, (C,), dtype=jnp.float32) * 0.1
    w2 = jax.random.normal(kw2, (C, C, 3, 3), dtype=jnp.float32) * 0.2
    b2 = jax.random.normal(kb2, (C,), dtype=jnp.float32) * 0.1

    out = jax.block_until_ready(resblock_pallas(x, w1, b1, w2, b2))
    ref = jax.block_until_ready(resblock_reference(x, w1, b1, w2, b2))

    max_err = float(jnp.max(jnp.abs(out - ref)))
    assert out.shape == (B, C, H, W)
    assert max_err < 1e-3, f"mismatch vs reference: {max_err}"

    print("KERNEL_OK")
</pallas_src>

<mosaic_0001>
module attributes {stable_mosaic.version = 11 : i64} {
  func.func @resblock_kernel(%arg0: i32, %arg1: memref<1x8x256xf32, #tpu.memory_space<vmem>>, %arg2: memref<9x8x8xf32, #tpu.memory_space<vmem>>, %arg3: memref<8x1xf32, #tpu.memory_space<vmem>>, %arg4: memref<9x8x8xf32, #tpu.memory_space<vmem>>, %arg5: memref<8x1xf32, #tpu.memory_space<vmem>>, %arg6: memref<1x8x256xf32, #tpu.memory_space<vmem>>) attributes {dimension_semantics = [#tpu.dimension_semantics<parallel>], iteration_bounds = array<i64: 2>, scalar_prefetch = 0 : i64, scratch_operands = 0 : i64, tpu.core_type = #tpu.core_type<tc>, window_params = [{transform_indices = @transform_0, window_bounds = array<i64: 1, 8, 256>}, {pipeline_mode = #tpu.pipeline_mode<synchronous>, transform_indices = @transform_1, window_bounds = array<i64: 9, 8, 8>}, {pipeline_mode = #tpu.pipeline_mode<synchronous>, transform_indices = @transform_2, window_bounds = array<i64: 8, 1>}, {pipeline_mode = #tpu.pipeline_mode<synchronous>, transform_indices = @transform_3, window_bounds = array<i64: 9, 8, 8>}, {pipeline_mode = #tpu.pipeline_mode<synchronous>, transform_indices = @transform_4, window_bounds = array<i64: 8, 1>}, {transform_indices = @transform_5, window_bounds = array<i64: 1, 8, 256>}]} {
    %c0 = arith.constant 0 : index
    %c0_0 = arith.constant 0 : index
    %c0_1 = arith.constant 0 : index
    %0 = vector.load %arg1[%c0, %c0_0, %c0_1] : memref<1x8x256xf32, #tpu.memory_space<vmem>>, vector<1x8x256xf32>
    %1 = vector.shape_cast %0 : vector<1x8x256xf32> to vector<8x256xf32>
    %2 = tpu.iota {dimensions = array<i32: 1>} : vector<8x256xi32>
    %c16_i32 = arith.constant 16 : i32
    %c0_i32 = arith.constant 0 : i32
    %3 = arith.cmpi eq, %c16_i32, %c0_i32 : i32
    %c1_i32 = arith.constant 1 : i32
    %4 = arith.select %3, %c1_i32, %c16_i32 : i32
    %5 = vector.broadcast %4 : i32 to vector<8x256xi32>
    %6 = arith.remsi %2, %5 : vector<8x256xi32>
    %c0_i32_2 = arith.constant 0 : i32
    %7 = vector.broadcast %c0_i32_2 : i32 to vector<8x256xi32>
    %8 = arith.cmpi ne, %6, %7 : vector<8x256xi32>
    %c0_i32_3 = arith.constant 0 : i32
    %9 = vector.broadcast %c0_i32_3 : i32 to vector<8x256xi32>
    %10 = arith.cmpi slt, %6, %9 : vector<8x256xi32>
    %c0_i32_4 = arith.constant 0 : i32
    %11 = arith.cmpi slt, %4, %c0_i32_4 : i32
    %12 = vector.broadcast %11 : i1 to vector<8x256xi1>
    %13 = vector.broadcast %12 : vector<8x256xi1> to vector<8x256xi1>
    %14 = arith.xori %10, %13 : vector<8x256xi1>
    %15 = arith.andi %14, %8 : vector<8x256xi1>
    %16 = vector.broadcast %4 : i32 to vector<8x256xi32>
    %17 = arith.addi %6, %16 : vector<8x256xi32>
    %18 = arith.select %15, %17, %6 : vector<8x256xi1>, vector<8x256xi32>
    %c16_i32_5 = arith.constant 16 : i32
    %19 = tpu.dynamic_rotate %1 by %c16_i32_5 dim 1 : vector<8x256xf32>, i32 -> vector<8x256xf32>
    %c240_i32 = arith.constant 240 : i32
    %20 = tpu.dynamic_rotate %1 by %c240_i32 dim 1 : vector<8x256xf32>, i32 -> vector<8x256xf32>
    %c16_i32_6 = arith.constant 16 : i32
    %21 = vector.broadcast %c16_i32_6 : i32 to vector<8x256xi32>
    %22 = arith.cmpi slt, %2, %21 : vector<8x256xi32>
    %23 = arith.select %22, %20, %19 : vector<8x256xi1>, vector<8x256xf32>
    %c1_i32_7 = arith.constant 1 : i32
    %24 = tpu.dynamic_rotate %23 by %c1_i32_7 dim 1 : vector<8x256xf32>, i32 -> vector<8x256xf32>
    %c255_i32 = arith.constant 255 : i32
    %25 = tpu.dynamic_rotate %23 by %c255_i32 dim 1 : vector<8x256xf32>, i32 -> vector<8x256xf32>
    %c0_i32_8 = arith.constant 0 : i32
    %26 = vector.broadcast %c0_i32_8 : i32 to vector<8x256xi32>
    %27 = arith.cmpi eq, %18, %26 : vector<8x256xi32>
    %28 = arith.select %27, %25, %24 : vector<8x256xi1>, vector<8x256xf32>
    %c0_9 = arith.constant 0 : index
    %c0_10 = arith.constant 0 : index
    %c0_11 = arith.constant 0 : index
    %29 = vector.load %arg2[%c0_9, %c0_10, %c0_11] : memref<9x8x8xf32, #tpu.memory_space<vmem>>, vector<1x8x8xf32>
    %30 = vector.shape_cast %29 : vector<1x8x8xf32> to vector<8x8xf32>
    %cst = arith.constant dense<0.000000e+00> : vector<8x256xf32>
    %31 = tpu.matmul %30, %28, %cst {dimension_numbers = #tpu.dot_dimension_numbers<[1], [0], [0], [1], [0, 0, 1, 1], [], []>} : vector<8x8xf32>, vector<8x256xf32>, vector<8x256xf32> -> vector<8x256xf32>
    %c1 = arith.constant 1 : index
    %c0_12 = arith.constant 0 : index
    %c0_13 = arith.constant 0 : index
    %32 = vector.load %arg2[%c1, %c0_12, %c0_13] : memref<9x8x8xf32, #tpu.memory_space<vmem>>, vector<1x8x8xf32>
    %33 = vector.shape_cast %32 : vector<1x8x8xf32> to vector<8x8xf32>
    %cst_14 = arith.constant dense<0.000000e+00> : vector<8x256xf32>
    %34 = tpu.matmul %33, %23, %cst_14 {dimension_numbers = #tpu.dot_dimension_numbers<[1], [0], [0], [1], [0, 0, 1, 1], [], []>} : vector<8x8xf32>, vector<8x256xf32>, vector<8x256xf32> -> vector<8x256xf32>
    %35 = arith.addf %31, %34 : vector<8x256xf32>
    %c1_i32_15 = arith.constant 1 : i32
    %36 = tpu.dynamic_rotate %23 by %c1_i32_15 dim 1 : vector<8x256xf32>, i32 -> vector<8x256xf32>
    %c255_i32_16 = arith.constant 255 : i32
    %37 = tpu.dynamic_rotate %23 by %c255_i32_16 dim 1 : vector<8x256xf32>, i32 -> vector<8x256xf32>
    %c15_i32 = arith.constant 15 : i32
    %38 = vector.broadcast %c15_i32 : i32 to vector<8x256xi32>
    %39 = arith.cmpi eq, %18, %38 : vector<8x256xi32>
    %40 = arith.select %39, %36, %37 : vector<8x256xi1>, vector<8x256xf32>
    %c2 = arith.constant 2 : index
    %c0_17 = arith.constant 0 : index
    %c0_18 = arith.constant 0 : index
    %41 = vector.load %arg2[%c2, %c0_17, %c0_18] : memref<9x8x8xf32, #tpu.memory_space<vmem>>, vector<1x8x8xf32>
    %42 = vector.shape_cast %41 : vector<1x8x8xf32> to vector<8x8xf32>
    %cst_19 = arith.constant dense<0.000000e+00> : vector<8x256xf32>
    %43 = tpu.matmul %42, %40, %cst_19 {dimension_numbers = #tpu.dot_dimension_numbers<[1], [0], [0], [1], [0, 0, 1, 1], [], []>} : vector<8x8xf32>, vector<8x256xf32>, vector<8x256xf32> -> vector<8x256xf32>
    %44 = arith.addf %35, %43 : vector<8x256xf32>
    %c1_i32_20 = arith.constant 1 : i32
    %45 = tpu.dynamic_rotate %1 by %c1_i32_20 dim 1 : vector<8x256xf32>, i32 -> vector<8x256xf32>
    %c255_i32_21 = arith.constant 255 : i32
    %46 = tpu.dynamic_rotate %1 by %c255_i32_21 dim 1 : vector<8x256xf32>, i32 -> vector<8x256xf32>
    %c0_i32_22 = arith.constant 0 : i32
    %47 = vector.broadcast %c0_i32_22 : i32 to vector<8x256xi32>
    %48 = arith.cmpi eq, %18, %47 : vector<8x256xi32>
    %49 = arith.select %48, %46, %45 : vector<8x256xi1>, vector<8x256xf32>
    %c3 = arith.constant 3 : index
    %c0_23 = arith.constant 0 : index
    %c0_24 = arith.constant 0 : index
    %50 = vector.load %arg2[%c3, %c0_23, %c0_24] : memref<9x8x8xf32, #tpu.memory_space<vmem>>, vector<1x8x8xf32>
    %51 = vector.shape_cast %50 : vector<1x8x8xf32> to vector<8x8xf32>
    %cst_25 = arith.constant dense<0.000000e+00> : vector<8x256xf32>
    %52 = tpu.matmul %51, %49, %cst_25 {dimension_numbers = #tpu.dot_dimension_numbers<[1], [0], [0], [1], [0, 0, 1, 1], [], []>} : vector<8x8xf32>, vector<8x256xf32>, vector<8x256xf32> -> vector<8x256xf32>
    %53 = arith.addf %44, %52 : vector<8x256xf32>
    %c4 = arith.constant 4 : index
    %c0_26 = arith.constant 0 : index
    %c0_27 = arith.constant 0 : index
    %54 = vector.load %arg2[%c4, %c0_26, %c0_27] : memref<9x8x8xf32, #tpu.memory_space<vmem>>, vector<1x8x8xf32>
    %55 = vector.shape_cast %54 : vector<1x8x8xf32> to vector<8x8xf32>
    %cst_28 = arith.constant dense<0.000000e+00> : vector<8x256xf32>
    %56 = tpu.matmul %55, %1, %cst_28 {dimension_numbers = #tpu.dot_dimension_numbers<[1], [0], [0], [1], [0, 0, 1, 1], [], []>} : vector<8x8xf32>, vector<8x256xf32>, vector<8x256xf32> -> vector<8x256xf32>
    %57 = arith.addf %53, %56 : vector<8x256xf32>
    %c1_i32_29 = arith.constant 1 : i32
    %58 = tpu.dynamic_rotate %1 by %c1_i32_29 dim 1 : vector<8x256xf32>, i32 -> vector<8x256xf32>
    %c255_i32_30 = arith.constant 255 : i32
    %59 = tpu.dynamic_rotate %1 by %c255_i32_30 dim 1 : vector<8x256xf32>, i32 -> vector<8x256xf32>
    %c15_i32_31 = arith.constant 15 : i32
    %60 = vector.broadcast %c15_i32_31 : i32 to vector<8x256xi32>
    %61 = arith.cmpi eq, %18, %60 : vector<8x256xi32>
    %62 = arith.select %61, %58, %59 : vector<8x256xi1>, vector<8x256xf32>
    %c5 = arith.constant 5 : index
    %c0_32 = arith.constant 0 : index
    %c0_33 = arith.constant 0 : index
    %63 = vector.load %arg2[%c5, %c0_32, %c0_33] : memref<9x8x8xf32, #tpu.memory_space<vmem>>, vector<1x8x8xf32>
    %64 = vector.shape_cast %63 : vector<1x8x8xf32> to vector<8x8xf32>
    %cst_34 = arith.constant dense<0.000000e+00> : vector<8x256xf32>
    %65 = tpu.matmul %64, %62, %cst_34 {dimension_numbers = #tpu.dot_dimension_numbers<[1], [0], [0], [1], [0, 0, 1, 1], [], []>} : vector<8x8xf32>, vector<8x256xf32>, vector<8x256xf32> -> vector<8x256xf32>
    %66 = arith.addf %57, %65 : vector<8x256xf32>
    %c16_i32_35 = arith.constant 16 : i32
    %67 = tpu.dynamic_rotate %1 by %c16_i32_35 dim 1 : vector<8x256xf32>, i32 -> vector<8x256xf32>
    %c240_i32_36 = arith.constant 240 : i32
    %68 = tpu.dynamic_rotate %1 by %c240_i32_36 dim 1 : vector<8x256xf32>, i32 -> vector<8x256xf32>
    %c240_i32_37 = arith.constant 240 : i32
    %69 = vector.broadcast %c240_i32_37 : i32 to vector<8x256xi32>
    %70 = arith.cmpi sge, %2, %69 : vector<8x256xi32>
    %71 = arith.select %70, %67, %68 : vector<8x256xi1>, vector<8x256xf32>
    %c1_i32_38 = arith.constant 1 : i32
    %72 = tpu.dynamic_rotate %71 by %c1_i32_38 dim 1 : vector<8x256xf32>, i32 -> vector<8x256xf32>
    %c255_i32_39 = arith.constant 255 : i32
    %73 = tpu.dynamic_rotate %71 by %c255_i32_39 dim 1 : vector<8x256xf32>, i32 -> vector<8x256xf32>
    %c0_i32_40 = arith.constant 0 : i32
    %74 = vector.broadcast %c0_i32_40 : i32 to vector<8x256xi32>
    %75 = arith.cmpi eq, %18, %74 : vector<8x256xi32>
    %76 = arith.select %75, %73, %72 : vector<8x256xi1>, vector<8x256xf32>
    %c6 = arith.constant 6 : index
    %c0_41 = arith.constant 0 : index
    %c0_42 = arith.constant 0 : index
    %77 = vector.load %arg2[%c6, %c0_41, %c0_42] : memref<9x8x8xf32, #tpu.memory_space<vmem>>, vector<1x8x8xf32>
    %78 = vector.shape_cast %77 : vector<1x8x8xf32> to vector<8x8xf32>
    %cst_43 = arith.constant dense<0.000000e+00> : vector<8x256xf32>
    %79 = tpu.matmul %78, %76, %cst_43 {dimension_numbers = #tpu.dot_dimension_numbers<[1], [0], [0], [1], [0, 0, 1, 1], [], []>} : vector<8x8xf32>, vector<8x256xf32>, vector<8x256xf32> -> vector<8x256xf32>
    %80 = arith.addf %66, %79 : vector<8x256xf32>
    %c7 = arith.constant 7 : index
    %c0_44 = arith.constant 0 : index
    %c0_45 = arith.constant 0 : index
    %81 = vector.load %arg2[%c7, %c0_44, %c0_45] : memref<9x8x8xf32, #tpu.memory_space<vmem>>, vector<1x8x8xf32>
    %82 = vector.shape_cast %81 : vector<1x8x8xf32> to vector<8x8xf32>
    %cst_46 = arith.constant dense<0.000000e+00> : vector<8x256xf32>
    %83 = tpu.matmul %82, %71, %cst_46 {dimension_numbers = #tpu.dot_dimension_numbers<[1], [0], [0], [1], [0, 0, 1, 1], [], []>} : vector<8x8xf32>, vector<8x256xf32>, vector<8x256xf32> -> vector<8x256xf32>
    %84 = arith.addf %80, %83 : vector<8x256xf32>
    %c1_i32_47 = arith.constant 1 : i32
    %85 = tpu.dynamic_rotate %71 by %c1_i32_47 dim 1 : vector<8x256xf32>, i32 -> vector<8x256xf32>
    %c255_i32_48 = arith.constant 255 : i32
    %86 = tpu.dynamic_rotate %71 by %c255_i32_48 dim 1 : vector<8x256xf32>, i32 -> vector<8x256xf32>
    %c15_i32_49 = arith.constant 15 : i32
    %87 = vector.broadcast %c15_i32_49 : i32 to vector<8x256xi32>
    %88 = arith.cmpi eq, %18, %87 : vector<8x256xi32>
    %89 = arith.select %88, %85, %86 : vector<8x256xi1>, vector<8x256xf32>
    %c8 = arith.constant 8 : index
    %c0_50 = arith.constant 0 : index
    %c0_51 = arith.constant 0 : index
    %90 = vector.load %arg2[%c8, %c0_50, %c0_51] : memref<9x8x8xf32, #tpu.memory_space<vmem>>, vector<1x8x8xf32>
    %91 = vector.shape_cast %90 : vector<1x8x8xf32> to vector<8x8xf32>
    %cst_52 = arith.constant dense<0.000000e+00> : vector<8x256xf32>
    %92 = tpu.matmul %91, %89, %cst_52 {dimension_numbers = #tpu.dot_dimension_numbers<[1], [0], [0], [1], [0, 0, 1, 1], [], []>} : vector<8x8xf32>, vector<8x256xf32>, vector<8x256xf32> -> vector<8x256xf32>
    %93 = arith.addf %84, %92 : vector<8x256xf32>
    %c0_53 = arith.constant 0 : index
    %c0_54 = arith.constant 0 : index
    %94 = vector.load %arg3[%c0_53, %c0_54] : memref<8x1xf32, #tpu.memory_space<vmem>>, vector<8x1xf32>
    %95 = vector.broadcast %94 : vector<8x1xf32> to vector<8x256xf32>
    %96 = arith.addf %93, %95 : vector<8x256xf32>
    %cst_55 = arith.constant dense<0.000000e+00> : vector<8xf32>
    %97 = vector.multi_reduction <add>, %96, %cst_55 [1] : vector<8x256xf32> to vector<8xf32>
    %98 = vector.shape_cast %97 : vector<8xf32> to vector<8x1xf32>
    %cst_56 = arith.constant 2.560000e+02 : f32
    %99 = vector.broadcast %cst_56 : f32 to vector<8x1xf32>
    %100 = arith.divf %98, %99 : vector<8x1xf32>
    %101 = vector.broadcast %100 : vector<8x1xf32> to vector<8x256xf32>
    %102 = arith.subf %96, %101 : vector<8x256xf32>
    %103 = vector.broadcast %100 : vector<8x1xf32> to vector<8x256xf32>
    %104 = arith.subf %96, %103 : vector<8x256xf32>
    %105 = arith.mulf %102, %104 : vector<8x256xf32>
    %cst_57 = arith.constant dense<0.000000e+00> : vector<8xf32>
    %106 = vector.multi_reduction <add>, %105, %cst_57 [1] : vector<8x256xf32> to vector<8xf32>
    %107 = vector.shape_cast %106 : vector<8xf32> to vector<8x1xf32>
    %cst_58 = arith.constant 2.560000e+02 : f32
    %108 = vector.broadcast %cst_58 : f32 to vector<8x1xf32>
    %109 = arith.divf %107, %108 : vector<8x1xf32>
    %110 = vector.broadcast %100 : vector<8x1xf32> to vector<8x256xf32>
    %111 = arith.subf %96, %110 : vector<8x256xf32>
    %cst_59 = arith.constant 9.99999974E-6 : f32
    %112 = vector.broadcast %cst_59 : f32 to vector<8x1xf32>
    %113 = arith.addf %109, %112 : vector<8x1xf32>
    %114 = math.rsqrt %113 : vector<8x1xf32>
    %115 = vector.broadcast %114 : vector<8x1xf32> to vector<8x256xf32>
    %116 = arith.mulf %111, %115 : vector<8x256xf32>
    %cst_60 = arith.constant 0.000000e+00 : f32
    %117 = vector.broadcast %cst_60 : f32 to vector<8x256xf32>
    %118 = arith.maximumf %116, %117 : vector<8x256xf32>
    %c16_i32_61 = arith.constant 16 : i32
    %119 = tpu.dynamic_rotate %118 by %c16_i32_61 dim 1 : vector<8x256xf32>, i32 -> vector<8x256xf32>
    %c240_i32_62 = arith.constant 240 : i32
    %120 = tpu.dynamic_rotate %118 by %c240_i32_62 dim 1 : vector<8x256xf32>, i32 -> vector<8x256xf32>
    %c16_i32_63 = arith.constant 16 : i32
    %121 = vector.broadcast %c16_i32_63 : i32 to vector<8x256xi32>
    %122 = arith.cmpi slt, %2, %121 : vector<8x256xi32>
    %123 = arith.select %122, %120, %119 : vector<8x256xi1>, vector<8x256xf32>
    %c1_i32_64 = arith.constant 1 : i32
    %124 = tpu.dynamic_rotate %123 by %c1_i32_64 dim 1 : vector<8x256xf32>, i32 -> vector<8x256xf32>
    %c255_i32_65 = arith.constant 255 : i32
    %125 = tpu.dynamic_rotate %123 by %c255_i32_65 dim 1 : vector<8x256xf32>, i32 -> vector<8x256xf32>
    %c0_i32_66 = arith.constant 0 : i32
    %126 = vector.broadcast %c0_i32_66 : i32 to vector<8x256xi32>
    %127 = arith.cmpi eq, %18, %126 : vector<8x256xi32>
    %128 = arith.select %127, %125, %124 : vector<8x256xi1>, vector<8x256xf32>
    %c0_67 = arith.constant 0 : index
    %c0_68 = arith.constant 0 : index
    %c0_69 = arith.constant 0 : index
    %129 = vector.load %arg4[%c0_67, %c0_68, %c0_69] : memref<9x8x8xf32, #tpu.memory_space<vmem>>, vector<1x8x8xf32>
    %130 = vector.shape_cast %129 : vector<1x8x8xf32> to vector<8x8xf32>
    %cst_70 = arith.constant dense<0.000000e+00> : vector<8x256xf32>
    %131 = tpu.matmul %130, %128, %cst_70 {dimension_numbers = #tpu.dot_dimension_numbers<[1], [0], [0], [1], [0, 0, 1, 1], [], []>} : vector<8x8xf32>, vector<8x256xf32>, vector<8x256xf32> -> vector<8x256xf32>
    %c1_71 = arith.constant 1 : index
    %c0_72 = arith.constant 0 : index
    %c0_73 = arith.constant 0 : index
    %132 = vector.load %arg4[%c1_71, %c0_72, %c0_73] : memref<9x8x8xf32, #tpu.memory_space<vmem>>, vector<1x8x8xf32>
    %133 = vector.shape_cast %132 : vector<1x8x8xf32> to vector<8x8xf32>
    %cst_74 = arith.constant dense<0.000000e+00> : vector<8x256xf32>
    %134 = tpu.matmul %133, %123, %cst_74 {dimension_numbers = #tpu.dot_dimension_numbers<[1], [0], [0], [1], [0, 0, 1, 1], [], []>} : vector<8x8xf32>, vector<8x256xf32>, vector<8x256xf32> -> vector<8x256xf32>
    %135 = arith.addf %131, %134 : vector<8x256xf32>
    %c1_i32_75 = arith.constant 1 : i32
    %136 = tpu.dynamic_rotate %123 by %c1_i32_75 dim 1 : vector<8x256xf32>, i32 -> vector<8x256xf32>
    %c255_i32_76 = arith.constant 255 : i32
    %137 = tpu.dynamic_rotate %123 by %c255_i32_76 dim 1 : vector<8x256xf32>, i32 -> vector<8x256xf32>
    %c15_i32_77 = arith.constant 15 : i32
    %138 = vector.broadcast %c15_i32_77 : i32 to vector<8x256xi32>
    %139 = arith.cmpi eq, %18, %138 : vector<8x256xi32>
    %140 = arith.select %139, %136, %137 : vector<8x256xi1>, vector<8x256xf32>
    %c2_78 = arith.constant 2 : index
    %c0_79 = arith.constant 0 : index
    %c0_80 = arith.constant 0 : index
    %141 = vector.load %arg4[%c2_78, %c0_79, %c0_80] : memref<9x8x8xf32, #tpu.memory_space<vmem>>, vector<1x8x8xf32>
    %142 = vector.shape_cast %141 : vector<1x8x8xf32> to vector<8x8xf32>
    %cst_81 = arith.constant dense<0.000000e+00> : vector<8x256xf32>
    %143 = tpu.matmul %142, %140, %cst_81 {dimension_numbers = #tpu.dot_dimension_numbers<[1], [0], [0], [1], [0, 0, 1, 1], [], []>} : vector<8x8xf32>, vector<8x256xf32>, vector<8x256xf32> -> vector<8x256xf32>
    %144 = arith.addf %135, %143 : vector<8x256xf32>
    %c1_i32_82 = arith.constant 1 : i32
    %145 = tpu.dynamic_rotate %118 by %c1_i32_82 dim 1 : vector<8x256xf32>, i32 -> vector<8x256xf32>
    %c255_i32_83 = arith.constant 255 : i32
    %146 = tpu.dynamic_rotate %118 by %c255_i32_83 dim 1 : vector<8x256xf32>, i32 -> vector<8x256xf32>
    %c0_i32_84 = arith.constant 0 : i32
    %147 = vector.broadcast %c0_i32_84 : i32 to vector<8x256xi32>
    %148 = arith.cmpi eq, %18, %147 : vector<8x256xi32>
    %149 = arith.select %148, %146, %145 : vector<8x256xi1>, vector<8x256xf32>
    %c3_85 = arith.constant 3 : index
    %c0_86 = arith.constant 0 : index
    %c0_87 = arith.constant 0 : index
    %150 = vector.load %arg4[%c3_85, %c0_86, %c0_87] : memref<9x8x8xf32, #tpu.memory_space<vmem>>, vector<1x8x8xf32>
    %151 = vector.shape_cast %150 : vector<1x8x8xf32> to vector<8x8xf32>
    %cst_88 = arith.constant dense<0.000000e+00> : vector<8x256xf32>
    %152 = tpu.matmul %151, %149, %cst_88 {dimension_numbers = #tpu.dot_dimension_numbers<[1], [0], [0], [1], [0, 0, 1, 1], [], []>} : vector<8x8xf32>, vector<8x256xf32>, vector<8x256xf32> -> vector<8x256xf32>
    %153 = arith.addf %144, %152 : vector<8x256xf32>
    %c4_89 = arith.constant 4 : index
    %c0_90 = arith.constant 0 : index
    %c0_91 = arith.constant 0 : index
    %154 = vector.load %arg4[%c4_89, %c0_90, %c0_91] : memref<9x8x8xf32, #tpu.memory_space<vmem>>, vector<1x8x8xf32>
    %155 = vector.shape_cast %154 : vector<1x8x8xf32> to vector<8x8xf32>
    %cst_92 = arith.constant dense<0.000000e+00> : vector<8x256xf32>
    %156 = tpu.matmul %155, %118, %cst_92 {dimension_numbers = #tpu.dot_dimension_numbers<[1], [0], [0], [1], [0, 0, 1, 1], [], []>} : vector<8x8xf32>, vector<8x256xf32>, vector<8x256xf32> -> vector<8x256xf32>
    %157 = arith.addf %153, %156 : vector<8x256xf32>
    %c1_i32_93 = arith.constant 1 : i32
    %158 = tpu.dynamic_rotate %118 by %c1_i32_93 dim 1 : vector<8x256xf32>, i32 -> vector<8x256xf32>
    %c255_i32_94 = arith.constant 255 : i32
    %159 = tpu.dynamic_rotate %118 by %c255_i32_94 dim 1 : vector<8x256xf32>, i32 -> vector<8x256xf32>
    %c15_i32_95 = arith.constant 15 : i32
    %160 = vector.broadcast %c15_i32_95 : i32 to vector<8x256xi32>
    %161 = arith.cmpi eq, %18, %160 : vector<8x256xi32>
    %162 = arith.select %161, %158, %159 : vector<8x256xi1>, vector<8x256xf32>
    %c5_96 = arith.constant 5 : index
    %c0_97 = arith.constant 0 : index
    %c0_98 = arith.constant 0 : index
    %163 = vector.load %arg4[%c5_96, %c0_97, %c0_98] : memref<9x8x8xf32, #tpu.memory_space<vmem>>, vector<1x8x8xf32>
    %164 = vector.shape_cast %163 : vector<1x8x8xf32> to vector<8x8xf32>
    %cst_99 = arith.constant dense<0.000000e+00> : vector<8x256xf32>
    %165 = tpu.matmul %164, %162, %cst_99 {dimension_numbers = #tpu.dot_dimension_numbers<[1], [0], [0], [1], [0, 0, 1, 1], [], []>} : vector<8x8xf32>, vector<8x256xf32>, vector<8x256xf32> -> vector<8x256xf32>
    %166 = arith.addf %157, %165 : vector<8x256xf32>
    %c16_i32_100 = arith.constant 16 : i32
    %167 = tpu.dynamic_rotate %118 by %c16_i32_100 dim 1 : vector<8x256xf32>, i32 -> vector<8x256xf32>
    %c240_i32_101 = arith.constant 240 : i32
    %168 = tpu.dynamic_rotate %118 by %c240_i32_101 dim 1 : vector<8x256xf32>, i32 -> vector<8x256xf32>
    %c240_i32_102 = arith.constant 240 : i32
    %169 = vector.broadcast %c240_i32_102 : i32 to vector<8x256xi32>
    %170 = arith.cmpi sge, %2, %169 : vector<8x256xi32>
    %171 = arith.select %170, %167, %168 : vector<8x256xi1>, vector<8x256xf32>
    %c1_i32_103 = arith.constant 1 : i32
    %172 = tpu.dynamic_rotate %171 by %c1_i32_103 dim 1 : vector<8x256xf32>, i32 -> vector<8x256xf32>
    %c255_i32_104 = arith.constant 255 : i32
    %173 = tpu.dynamic_rotate %171 by %c255_i32_104 dim 1 : vector<8x256xf32>, i32 -> vector<8x256xf32>
    %c0_i32_105 = arith.constant 0 : i32
    %174 = vector.broadcast %c0_i32_105 : i32 to vector<8x256xi32>
    %175 = arith.cmpi eq, %18, %174 : vector<8x256xi32>
    %176 = arith.select %175, %173, %172 : vector<8x256xi1>, vector<8x256xf32>
    %c6_106 = arith.constant 6 : index
    %c0_107 = arith.constant 0 : index
    %c0_108 = arith.constant 0 : index
    %177 = vector.load %arg4[%c6_106, %c0_107, %c0_108] : memref<9x8x8xf32, #tpu.memory_space<vmem>>, vector<1x8x8xf32>
    %178 = vector.shape_cast %177 : vector<1x8x8xf32> to vector<8x8xf32>
    %cst_109 = arith.constant dense<0.000000e+00> : vector<8x256xf32>
    %179 = tpu.matmul %178, %176, %cst_109 {dimension_numbers = #tpu.dot_dimension_numbers<[1], [0], [0], [1], [0, 0, 1, 1], [], []>} : vector<8x8xf32>, vector<8x256xf32>, vector<8x256xf32> -> vector<8x256xf32>
    %180 = arith.addf %166, %179 : vector<8x256xf32>
    %c7_110 = arith.constant 7 : index
    %c0_111 = arith.constant 0 : index
    %c0_112 = arith.constant 0 : index
    %181 = vector.load %arg4[%c7_110, %c0_111, %c0_112] : memref<9x8x8xf32, #tpu.memory_space<vmem>>, vector<1x8x8xf32>
    %182 = vector.shape_cast %181 : vector<1x8x8xf32> to vector<8x8xf32>
    %cst_113 = arith.constant dense<0.000000e+00> : vector<8x256xf32>
    %183 = tpu.matmul %182, %171, %cst_113 {dimension_numbers = #tpu.dot_dimension_numbers<[1], [0], [0], [1], [0, 0, 1, 1], [], []>} : vector<8x8xf32>, vector<8x256xf32>, vector<8x256xf32> -> vector<8x256xf32>
    %184 = arith.addf %180, %183 : vector<8x256xf32>
    %c1_i32_114 = arith.constant 1 : i32
    %185 = tpu.dynamic_rotate %171 by %c1_i32_114 dim 1 : vector<8x256xf32>, i32 -> vector<8x256xf32>
    %c255_i32_115 = arith.constant 255 : i32
    %186 = tpu.dynamic_rotate %171 by %c255_i32_115 dim 1 : vector<8x256xf32>, i32 -> vector<8x256xf32>
    %c15_i32_116 = arith.constant 15 : i32
    %187 = vector.broadcast %c15_i32_116 : i32 to vector<8x256xi32>
    %188 = arith.cmpi eq, %18, %187 : vector<8x256xi32>
    %189 = arith.select %188, %185, %186 : vector<8x256xi1>, vector<8x256xf32>
    %c8_117 = arith.constant 8 : index
    %c0_118 = arith.constant 0 : index
    %c0_119 = arith.constant 0 : index
    %190 = vector.load %arg4[%c8_117, %c0_118, %c0_119] : memref<9x8x8xf32, #tpu.memory_space<vmem>>, vector<1x8x8xf32>
    %191 = vector.shape_cast %190 : vector<1x8x8xf32> to vector<8x8xf32>
    %cst_120 = arith.constant dense<0.000000e+00> : vector<8x256xf32>
    %192 = tpu.matmul %191, %189, %cst_120 {dimension_numbers = #tpu.dot_dimension_numbers<[1], [0], [0], [1], [0, 0, 1, 1], [], []>} : vector<8x8xf32>, vector<8x256xf32>, vector<8x256xf32> -> vector<8x256xf32>
    %193 = arith.addf %184, %192 : vector<8x256xf32>
    %c0_121 = arith.constant 0 : index
    %c0_122 = arith.constant 0 : index
    %194 = vector.load %arg5[%c0_121, %c0_122] : memref<8x1xf32, #tpu.memory_space<vmem>>, vector<8x1xf32>
    %195 = vector.broadcast %194 : vector<8x1xf32> to vector<8x256xf32>
    %196 = arith.addf %193, %195 : vector<8x256xf32>
    %cst_123 = arith.constant dense<0.000000e+00> : vector<8xf32>
    %197 = vector.multi_reduction <add>, %196, %cst_123 [1] : vector<8x256xf32> to vector<8xf32>
    %198 = vector.shape_cast %197 : vector<8xf32> to vector<8x1xf32>
    %cst_124 = arith.constant 2.560000e+02 : f32
    %199 = vector.broadcast %cst_124 : f32 to vector<8x1xf32>
    %200 = arith.divf %198, %199 : vector<8x1xf32>
    %201 = vector.broadcast %200 : vector<8x1xf32> to vector<8x256xf32>
    %202 = arith.subf %196, %201 : vector<8x256xf32>
    %203 = vector.broadcast %200 : vector<8x1xf32> to vector<8x256xf32>
    %204 = arith.subf %196, %203 : vector<8x256xf32>
    %205 = arith.mulf %202, %204 : vector<8x256xf32>
    %cst_125 = arith.constant dense<0.000000e+00> : vector<8xf32>
    %206 = vector.multi_reduction <add>, %205, %cst_125 [1] : vector<8x256xf32> to vector<8xf32>
    %207 = vector.shape_cast %206 : vector<8xf32> to vector<8x1xf32>
    %cst_126 = arith.constant 2.560000e+02 : f32
    %208 = vector.broadcast %cst_126 : f32 to vector<8x1xf32>
    %209 = arith.divf %207, %208 : vector<8x1xf32>
    %210 = vector.broadcast %200 : vector<8x1xf32> to vector<8x256xf32>
    %211 = arith.subf %196, %210 : vector<8x256xf32>
    %cst_127 = arith.constant 9.99999974E-6 : f32
    %212 = vector.broadcast %cst_127 : f32 to vector<8x1xf32>
    %213 = arith.addf %209, %212 : vector<8x1xf32>
    %214 = math.rsqrt %213 : vector<8x1xf32>
    %215 = vector.broadcast %214 : vector<8x1xf32> to vector<8x256xf32>
    %216 = arith.mulf %211, %215 : vector<8x256xf32>
    %217 = arith.addf %1, %216 : vector<8x256xf32>
    %c0_128 = arith.constant 0 : index
    %c0_129 = arith.constant 0 : index
    %c0_130 = arith.constant 0 : index
    %218 = vector.load %arg6[%c0_128, %c0_129, %c0_130] : memref<1x8x256xf32, #tpu.memory_space<vmem>>, vector<1x8x256xf32>
    %219 = vector.shape_cast %218 : vector<1x8x256xf32> to vector<8x256xf32>
    %220 = vector.shape_cast %217 : vector<8x256xf32> to vector<1x8x256xf32>
    tpu.vector_store %arg6[%c0_128, %c0_129, %c0_130], %220 {strides = array<i32>} : memref<1x8x256xf32, #tpu.memory_space<vmem>>, vector<1x8x256xf32>,
    return
  }
  func.func @transform_0(%arg0: i32) -> (i32, i32, i32) {
    %c0_i32 = arith.constant 0 : i32
    %c0_i32_0 = arith.constant 0 : i32
    %c0_i32_1 = arith.constant 0 : i32
    return %arg0, %c0_i32, %c0_i32_0 : i32, i32, i32
  }
  func.func @transform_1(%arg0: i32) -> (i32, i32, i32) {
    %c0_i32 = arith.constant 0 : i32
    %c0_i32_0 = arith.constant 0 : i32
    %c0_i32_1 = arith.constant 0 : i32
    %c0_i32_2 = arith.constant 0 : i32
    return %c0_i32, %c0_i32_0, %c0_i32_1 : i32, i32, i32
  }
  func.func @transform_2(%arg0: i32) -> (i32, i32) {
    %c0_i32 = arith.constant 0 : i32
    %c0_i32_0 = arith.constant 0 : i32
    %c0_i32_1 = arith.constant 0 : i32
    return %c0_i32, %c0_i32_0 : i32, i32
  }
  func.func @transform_3(%arg0: i32) -> (i32, i32, i32) {
    %c0_i32 = arith.constant 0 : i32
    %c0_i32_0 = arith.constant 0 : i32
    %c0_i32_1 = arith.constant 0 : i32
    %c0_i32_2 = arith.constant 0 : i32
    return %c0_i32, %c0_i32_0, %c0_i32_1 : i32, i32, i32
  }
  func.func @transform_4(%arg0: i32) -> (i32, i32) {
    %c0_i32 = arith.constant 0 : i32
    %c0_i32_0 = arith.constant 0 : i32
    %c0_i32_1 = arith.constant 0 : i32
    return %c0_i32, %c0_i32_0 : i32, i32
  }
  func.func @transform_5(%arg0: i32) -> (i32, i32, i32) {
    %c0_i32 = arith.constant 0 : i32
    %c0_i32_0 = arith.constant 0 : i32
    %c0_i32_1 = arith.constant 0 : i32
    return %arg0, %c0_i32, %c0_i32_0 : i32, i32, i32
  }
}

</mosaic_0001>

<bundles_post_ra>
// kernel: tpu_custom_call.1
= control target key start
LH: loop header
LB: loop body
LE: loop exit
PB: predicated region body
PF: predicated region fallthrough
CT: control target
= control target key end

     0   :  { %10 = vsyncpa [#allocation3], 0  ;;  %s2521_s0 = inlined_call_operand.vmem [shape: f32[2,8,256], index: 0, kind: input, shape index: {}]   ;;  %s2522_s1 = inlined_call_operand.vmem [shape: f32[9,8,8], index: 1, kind: input, shape index: {}]   ;;  %s2523_s2 = inlined_call_operand.vmem [shape: f32[8,1], index: 2, kind: input, shape index: {}]   ;;  %s2524_s3 = inlined_call_operand.vmem [shape: f32[9,8,8], index: 3, kind: input, shape index: {}]   ;;  %s2525_s4 = inlined_call_operand.vmem [shape: f32[8,1], index: 4, kind: input, shape index: {}]   ;;  %s2526_s5 = inlined_call_operand.hbm [shape: f32[2,8,256], index: 5, kind: output, shape index: {}]  }
   0x1   :  { %12 = vsyncpa [#allocation3 + $0x1], 0  ;;  %s2112_s18 = smov 0   ;;  %s2114_s19 = smov 0  }
   0x2   :  { %s2116_s20 = smov 0   ;;  %s2118_s21 = smov 0  }
   0x3 LB: > { %s2133_s22 = sadd.s32 4294967295, %s2073_s21   ;;  %s1915_s23 = sadd.s32 4294967294, %s2073_s21   ;;  %s2073_s21 = sphi %s2118_s21, %s2540_s21   ;;  %s2069_s20 = sphi %s2116_s20, %s2539_s20   ;;  %s2065_s19 = sphi %s2114_s19, %s2538_s19   ;;  %s2061_s18 = sphi %s2112_s18, %s2537_s18  }
   0x4   : > { %s2137_s24 = sadd.s32 1, %s2073_s21   ;;  %s135_s25 = sadd.s32 1, %s2069_s20 }
   0x5   : > { %s132_s26 = ssub.s32 %s2073_s21, %s2137_s24  ;;  %p145_p0 = scmp.ne.s32.totalorder %s2069_s20, %s2065_s19 }
   0x6   : > { %p133_p1 = scmp.eq.s32.totalorder %s132_s26, 0  ;;  %p146_p2 = scmp.eq.s32.totalorder %s2133_s22, 1 }
   0x7   : > { %p151_p3 = scmp.ne.s32.totalorder %s2065_s19, %s2061_s18  ;;  %p152_p4 = scmp.eq.s32.totalorder %s1915_s23, 1 }
   0x8   : > { %s2148_s27 = scalar_select %p133_p1, %s2069_s20, %s135_s25  }
   0x9   : > { %p2150_p5 = por %p146_p2, %p145_p0  ;;  %p2154_p6 = por %p152_p4, %p151_p3 }
   0xa   : > { %p1918_p7 = scmp.ge.s32.totalorder %s2073_s21, 1  ;;  %p190_p8 = scmp.lt.s32.totalorder %s2073_s21, 3 }
   0xc   : > { %p191_p9 = pnand %p1918_p7, %p190_p8 }
   0xd   : > { %p218_p10 = scmp.lt.s32.totalorder (!%p191_p9), %s2133_s22, 1  ;;  %s2075_s10 = smov (!%p191_p9), 112  }
   0xe   : > { %194 = sbr.rel (%p191_p9) target bundleno = 1575 (0x627), region = 40  ;;  %s2076_s11 = smov (!%p191_p9), 16  }
   0xf   : > { %s2077_s12 = smov (!%p191_p9), 1   ;;  %s2079_s15 = smov (!%p191_p9), 127  }
  0x10   : > { %s1962_s8 = sshll.u32 (!%p191_p9), %s2133_s22, 8 }
  0x11   : > { %s2486_s17 = scalar_lea.hbm (!%p191_p9), %s2526_s5, %s1962_s8 }
  0x13   : > { %s219_s30 = scalar_select %p218_p10, %s2133_s22, 1  ;;  %v225_v2 = vlaneseq  ;;  %v2078_v4 = vmov 0.0   ;;  %v1922_v12 = vld [vmem:[%s2522_s1 + $0x8] sm:$0xff]  ;;  %vm290_vm2 = vcmask 64512   ;;  %v2080_v17 = vmov 0   ;;  %v1025_v18 = vld [vmem:[%s2523_s2] sm:$0xff] }
  0x14   : > { %358 = vmatprep.mubr.f32.mxu0 %v2078_v4  ;;  %432 = vmatprep.mubr.f32.mxu1 %v2078_v4  ;;  %v287_v39 = vld [vmem:[%s2522_s1] sm:$0xff]  ;;  %v1925_v40 = vld [vmem:[%s2522_s1 + $0x10] sm:$0xff]  ;;  %v1927_v49 = vld [vmem:[%s2522_s1 + $0x18] sm:$0xff]  ;;  %s2081_s22 = smov [#allocation2]  }
  0x15   : > { %s1961_s6 = sshll.u32 %s219_s30, 4  ;;  %v2181_v3 = vand.u32 127, %v225_v2  ;;  %2008 = vset.pattern.permute.xlu0 %v2080_v17  ;;  %v1929_v51 = vld [vmem:[%s2522_s1 + $0x20] sm:$0xff]  ;;  %v1931_v55 = vld [vmem:[%s2522_s1 + $0x28] sm:$0xff]  ;;  %v1933_v2 = vld [vmem:[%s2522_s1 + $0x30] sm:$0xff]  ;;  %s2017_s26 = sshll.u32 %s2081_s22, 4  ;;  %s2018_s26 = int_to_ptr.vmem [resolvable:$false] %s2017_s26 }
  0x16   : > { %s222_s9 = scalar_lea.vmem %s2521_s0, %s1961_s6  ;;  %v1954_v28 = vld [vmem:[%s2524_s3 + $0x40] sm:$0xff]  ;;  %s2019_s30 = scalar_lea.vmem %s2018_s26, 512 }
  0x17   : > { %v2165_v0 = vld [vmem:[%s222_s9] sm:$0xff]  ;;  %v2171_v1 = vld [vmem:[%s222_s9 + $0x8] sm:$0xff]  ;;  %vm263_vm0 = vcmp.lt.s32.totalorder %v2181_v3, 112  ;;  %vm256_vm1 = vcmp.lt.s32.totalorder %v2181_v3, 16  ;;  %v2207_v14 = vadd.s32 128, %v2181_v3  ;;  %v232_v23 = vand.u32 15, %v2181_v3 }
  0x18   : > { %259 = vrot.lane.b32.xlu1 %v2165_v0, %s2075_s10  ;;  %252 = vrot.lane.b32.xlu0 %v2165_v0, %s2076_s11  ;;  %vm280_vm4 = vcmp.lt.s32.totalorder %v2181_v3, 127  ;;  %vm273_vm9 = vcmp.lt.s32.totalorder %v2181_v3, 1  ;;  %v1952_v3 = vld [vmem:[%s2524_s3 + $0x38] sm:$0xff] }
  0x19   : > { %vm772_vm3 = vcmp.ge.s32.totalorder %v2207_v14, 240  ;;  %v239_v21 = vand.u32 15, %v2207_v14  ;;  %vm2243_vm7 = vcmp.eq.s32.totalorder %v232_v23, 0  ;;  %vm2247_vm8 = vcmp.eq.s32.totalorder %v232_v23, 15  ;;  %v1813_v14 = vld [vmem:[%s2525_s4] sm:$0xff] }
  0x1b   : > { %vm2235_vm5 = vcmp.eq.s32.totalorder %v239_v21, 15  ;;  %vm2239_vm6 = vcmp.eq.s32.totalorder %v239_v21, 0 }
  0x1c   : > { %261 = vrot.lane.b32.xlu1 %v2171_v1, %s2075_s10  ;;  %254 = vrot.lane.b32.xlu0 %v2171_v1, %s2076_s11 }
  0x20   : > { %523 = vrot.lane.b32.xlu1 %v2171_v1, %s2077_s12  ;;  %521 = vrot.lane.b32.xlu0 %v2165_v0, %s2077_s12 }
  0x8a   : > { %v260_v5 = vpop.permute.xlu1 %259  ;;  %v253_v6 = vpop.permute.xlu0 %252 }
  0x8e   : > { %v262_v7 = vpop.permute.xlu1 %261  ;;  %v255_v8 = vpop.permute.xlu0 %254 }
  0x8f   : > { %v2189_v9 = vsel %vm263_vm0, %v260_v5, %v262_v7  ;;  %v257_v10 = vsel %vm256_vm1, %v253_v6, %v255_v8  ;;  %v258_v11 = vsel %vm256_vm1, %v255_v8, %v253_v6  ;;  %v265_v15 = vsel %vm263_vm0, %v262_v7, %v260_v5  ;;  %v1935_v5 = vld [vmem:[%s2522_s1 + $0x38] sm:$0xff]  ;;  %v1937_v8 = vld [vmem:[%s2522_s1 + $0x40] sm:$0xff] }
  0x90   : > { %271 = vrot.lane.b32.xlu1 %v257_v10, %s2077_s12  ;;  %324 = vmatprep.subr.mxu0 %v257_v10  ;;  %v267_v13 = vsel %vm256_vm1, %v2189_v9, %v258_v11  ;;  %v2219_v16 = vsel %vm772_vm3, %v257_v10, %v265_v15 }
  0x91   : > { %269 = vrot.lane.b32.xlu0 %v267_v13, %s2077_s12  ;;  %325 = vmatpush1.msra.mxu0 %v267_v13 }
  0x92   : > { %1923 = vmatmul.mubr.msk.f32.vlgmr.msra.gmra.mxu0 %vm290_vm2, %v1922_v12  ;;  %v524_v19 = vpop.permute.xlu1 %523  ;;  %v522_v20 = vpop.permute.xlu0 %521 }
  0x93   : > { %512 = vmatprep.mubr.f32.mxu0 %v2078_v4  ;;  %v525_v42 = vsel %vm273_vm9, %v522_v20, %v524_v19  ;;  %v526_v44 = vsel %vm273_vm9, %v524_v19, %v522_v20 }
  0x94   : > { %278 = vrot.lane.b32.xlu1 %v257_v10, %s2079_s15 }
  0x95   : > { %276 = vrot.lane.b32.xlu0 %v267_v13, %s2079_s15 }
  0x98   : > { %529 = vrot.lane.b32.xlu1 %v2171_v1, %s2079_s15 }
  0x99   : > { %527 = vrot.lane.b32.xlu0 %v2165_v0, %s2079_s15 }
  0x9c   : > { %777 = vrot.lane.b32.xlu1 %v2219_v16, %s2077_s12 }
  0x9d   : > { %775 = vrot.lane.b32.xlu0 %v2189_v9, %s2077_s12 }
  0xa0   : > { %783 = vrot.lane.b32.xlu1 %v2219_v16, %s2079_s15 }
  0xa1   : > { %781 = vrot.lane.b32.xlu0 %v2189_v9, %s2079_s15 }
  0xa5   : > { %1028 = vperm.xlu0 %2008, %v1025_v18  }
 0x102   : > { %v272_v22 = vpop.permute.xlu1 %271 }
 0x103   : > { %v270_v24 = vpop.permute.xlu0 %269 }
 0x104   : > { %v274_v31 = vsel %vm273_vm9, %v270_v24, %v272_v22  ;;  %v275_v32 = vsel %vm273_vm9, %v272_v22, %v270_v24 }
 0x106   : > { %v279_v26 = vpop.permute.xlu1 %278 }
 0x107   : > { %v277_v30 = vpop.permute.xlu0 %276 }
 0x108   : > { %v281_v33 = vsel %vm280_vm4, %v277_v30, %v279_v26  ;;  %v282_v34 = vsel %vm280_vm4, %v279_v26, %v277_v30 }
 0x109   : > { %v286_v35 = vsel %vm2239_vm6, %v282_v34, %v274_v31  ;;  %v442_v36 = vsel %vm2235_vm5, %v274_v31, %v282_v34  ;;  %v285_v37 = vsel %vm2243_vm7, %v281_v33, %v275_v32  ;;  %v441_v38 = vsel %vm2247_vm8, %v275_v32, %v281_v33 }
 0x10a   : > { %v530_v41 = vpop.permute.xlu1 %529  ;;  %398 = vmatprep.subr.mxu1 %v286_v35  ;;  %478 = vmatprep.subr.mxu0 %v442_v36 }
 0x10b   : > { %399 = vmatpush1.msra.mxu1 %v285_v37  ;;  %479 = vmatpush1.msra.mxu0 %v441_v38  ;;  %v528_v43 = vpop.permute.xlu0 %527 }
 0x10c   : > { %v531_v45 = vsel %vm280_vm4, %v528_v43, %v530_v41  ;;  %v532_v46 = vsel %vm280_vm4, %v530_v41, %v528_v43  ;;  %1924 = vmatmul.mubr.msk.f32.vlgmr.msra.gmra.mxu1 %vm290_vm2, %v287_v39  ;;  %1926 = vmatmul.mubr.msk.f32.vlgmr.msra.gmra.mxu0 %vm290_vm2, %v1925_v40 }
 0x10d   : > { %v534_v47 = vsel %vm2239_vm6, %v532_v46, %v525_v42  ;;  %v533_v48 = vsel %vm2243_vm7, %v531_v45, %v526_v44  ;;  %604 = vmatprep.mubr.f32.mxu1 %v2078_v4  ;;  %648 = vmatprep.subr.mxu0 %v2171_v1  ;;  %v692_v53 = vsel %vm2235_vm5, %v525_v42, %v532_v46 }
 0x10e   : > { %v778_v50 = vpop.permute.xlu1 %777  ;;  %570 = vmatprep.subr.mxu1 %v534_v47  ;;  %649 = vmatpush1.msra.mxu0 %v2165_v0  ;;  %v691_v54 = vsel %vm2247_vm8, %v526_v44, %v531_v45 }
 0x10f   : > { %571 = vmatpush1.msra.mxu1 %v533_v48  ;;  %v776_v52 = vpop.permute.xlu0 %775  ;;  %682 = vmatprep.mubr.f32.mxu0 %v2078_v4 }
 0x110   : > { %1928 = vmatmul.mubr.msk.f32.vlgmr.msra.gmra.mxu1 %vm290_vm2, %v1927_v49  ;;  %728 = vmatprep.subr.mxu1 %v692_v53  ;;  %v779_v58 = vsel %vm273_vm9, %v776_v52, %v778_v50  ;;  %v780_v59 = vsel %vm273_vm9, %v778_v50, %v776_v52 }
 0x111   : > { %729 = vmatpush1.msra.mxu1 %v691_v54  ;;  %1930 = vmatmul.mubr.msk.f32.vlgmr.msra.gmra.mxu0 %vm290_vm2, %v1929_v51 }
 0x112   : > { %v784_v56 = vpop.permute.xlu1 %783  ;;  %902 = vmatprep.subr.mxu1 %v2219_v16  ;;  %762 = vmatprep.mubr.f32.mxu1 %v2078_v4 }
 0x113   : > { %v782_v57 = vpop.permute.xlu0 %781  ;;  %858 = vmatprep.mubr.f32.mxu0 %v2078_v4 }
 0x114   : > { %v785_v60 = vsel %vm280_vm4, %v782_v57, %v784_v56  ;;  %v786_v61 = vsel %vm280_vm4, %v784_v56, %v782_v57  ;;  %1932 = vmatmul.mubr.msk.f32.vlgmr.msra.gmra.mxu1 %vm290_vm2, %v1931_v55 }
 0x115   : > { %903 = vmatpush1.msra.mxu1 %v2189_v9  ;;  %v788_v62 = vsel %vm2239_vm6, %v786_v61, %v779_v58  ;;  %v787_v63 = vsel %vm2243_vm7, %v785_v60, %v780_v59  ;;  %936 = vmatprep.mubr.f32.mxu1 %v2078_v4  ;;  %v946_v6 = vsel %vm2235_vm5, %v779_v58, %v786_v61 }
 0x116   : > { %824 = vmatprep.subr.mxu0 %v788_v62  ;;  %v945_v7 = vsel %vm2247_vm8, %v780_v59, %v785_v60 }
 0x117   : > { %825 = vmatpush1.msra.mxu0 %v787_v63 }
 0x118   : > { %1934 = vmatmul.mubr.msk.f32.vlgmr.msra.gmra.mxu0 %vm290_vm2, %v1933_v2  ;;  %1936 = vmatmul.mubr.msk.f32.vlgmr.msra.gmra.mxu1 %vm290_vm2, %v1935_v5 }
 0x119   : > { %982 = vmatprep.subr.mxu0 %v946_v6  ;;  %1016 = vmatprep.mubr.f32.mxu0 %v2078_v4 }
 0x11a   : > { %983 = vmatpush1.msra.mxu0 %v945_v7  ;;  %1150 = vmatprep.mubr.f32.mxu1 %v2078_v4 }
 0x11c   : > { %1938 = vmatmul.mubr.msk.f32.vlgmr.msra.gmra.mxu0 %vm290_vm2, %v1937_v8 }
 0x11d   : > { %1224 = vmatprep.mubr.f32.mxu0 %v2078_v4 }
 0x120   : > { %v1029_v47 = vpop.permute.xlu0 %1028 }
 0x152   : > { %v360_v9 = vpop.f32.mrf.mxu0 }
 0x154   : > { %v362_v10 = vpop.f32.mrf.mxu0 }
 0x1cc   : > { %v434_v11 = vpop.f32.mrf.mxu1  ;;  %v514_v12 = vpop.f32.mrf.mxu0 }
 0x1cd   : > { %v435_v13 = vadd.f32 %v434_v11, %v360_v9 }
 0x1ce   : > { %v436_v15 = vpop.f32.mrf.mxu1  ;;  %v516_v16 = vpop.f32.mrf.mxu0 }
 0x1cf   : > { %v437_v17 = vadd.f32 %v436_v15, %v362_v10  ;;  %v519_v18 = vadd.f32 %v514_v12, %v435_v13  ;;  %v1939_v15 = vld [vmem:[%s2524_s3 + $0x8] sm:$0xff] }
 0x1d0   : > { %v606_v19 = vpop.f32.mrf.mxu1 }
 0x1d1   : > { %v520_v20 = vadd.f32 %v516_v16, %v437_v17  ;;  %v611_v21 = vadd.f32 %v606_v19, %v519_v18  ;;  %v684_v22 = vpop.f32.mrf.mxu0 }
 0x1d2   : > { %v608_v23 = vpop.f32.mrf.mxu1 }
 0x1d3   : > { %v612_v24 = vadd.f32 %v608_v23, %v520_v20  ;;  %v689_v26 = vadd.f32 %v684_v22, %v611_v21  ;;  %v686_v30 = vpop.f32.mrf.mxu0 }
 0x1d4   : > { %v764_v31 = vpop.f32.mrf.mxu1 }
 0x1d5   : > { %v690_v32 = vadd.f32 %v686_v30, %v612_v24  ;;  %v769_v34 = vadd.f32 %v764_v31, %v689_v26 }
 0x1d6   : > { %v766_v33 = vpop.f32.mrf.mxu1 }
 0x1d7   : > { %v770_v37 = vadd.f32 %v766_v33, %v690_v32 }
 0x1d8   : > { %v860_v35 = vpop.f32.mrf.mxu0  ;;  %v938_v36 = vpop.f32.mrf.mxu1 }
 0x1d9   : > { %v865_v38 = vadd.f32 %v860_v35, %v769_v34 }
 0x1da   : > { %v862_v39 = vpop.f32.mrf.mxu0  ;;  %v940_v42 = vpop.f32.mrf.mxu1 }
 0x1db   : > { %v943_v40 = vadd.f32 %v938_v36, %v865_v38  ;;  %v866_v41 = vadd.f32 %v862_v39, %v770_v37  ;;  %v1080_v38 = vld [vmem:[%s2524_s3] sm:$0xff]  ;;  %v1942_v39 = vld [vmem:[%s2524_s3 + $0x10] sm:$0xff] }
 0x1dc   : > { %v1018_v43 = vpop.f32.mrf.mxu0 }
 0x1dd   : > { %v944_v44 = vadd.f32 %v940_v42, %v866_v41  ;;  %v1023_v45 = vadd.f32 %v1018_v43, %v943_v40 }
 0x1de   : > { %v1020_v46 = vpop.f32.mrf.mxu0 }
 0x1df   : > { %v1024_v48 = vadd.f32 %v1020_v46, %v944_v44  ;;  %v1031_v49 = vadd.f32 %v1029_v47, %v1023_v45 }
 0x1e1   : > { %v1032_v50 = vadd.f32 %v1029_v47, %v1024_v48  ;;  %v1944_v48 = vld [vmem:[%s2524_s3 + $0x18] sm:$0xff] }
 0x1e3   : > { %v1033_v51 = vadd.f32 %v1032_v50, %v1031_v49 }
 0x1e5   : > { %1034 = vadd.xlane.f32.xlu1 %v1033_v51 }
 0x26e   : > { %v1035_v52 = vpop.xlane.xlu1 %1034 }
 0x26f   : > { %v1037_v53 = vmul.f32 0.00390625, %v1035_v52 }
 0x271   : > { %v1038_v54 = vsub.f32 %v1031_v49, %v1037_v53  ;;  %v1039_v55 = vsub.f32 %v1032_v50, %v1037_v53  ;;  %v1946_v49 = vld [vmem:[%s2524_s3 + $0x20] sm:$0xff]  ;;  %v1948_v53 = vld [vmem:[%s2524_s3 + $0x28] sm:$0xff] }
 0x273   : > { %v1040_v56 = vmul.f32 %v1038_v54, %v1038_v54  ;;  %v1041_v57 = vmul.f32 %v1039_v55, %v1039_v55 }
 0x275   : > { %v1042_v58 = vadd.f32 %v1041_v57, %v1040_v56 }
 0x277   : > { %1043 = vadd.xlane.f32.xlu0 %v1042_v58 }
 0x300   : > { %v1044_v59 = vpop.xlane.xlu0 %1043 }
 0x301   : > { %v1045_v60 = vmul.f32 0.00390625, %v1044_v59 }
 0x303   : > { %v1046_v61 = vadd.f32 1e-05, %v1045_v60 }
 0x305   : > { %2009 = vrsqrt.f32 %v1046_v61 }
 0x312   : > { %v2010_v62 = vpop.eup %2009 }
 0x313   : > { %v1049_v63 = vmul.f32 %v2010_v62, %v1039_v55  ;;  %v1048_v2 = vmul.f32 %v2010_v62, %v1038_v54  ;;  %v1950_v62 = vld [vmem:[%s2524_s3 + $0x30] sm:$0xff] }
 0x315   : > { %v1051_v5 = vmax.f32 %v1049_v63, 0.0  ;;  %v2344_v6 = vmax.f32 %v1048_v2, 0.0 }
 0x317   : > { %1054 = vrot.lane.b32.xlu0 %v1051_v5, %s2076_s11  ;;  %1052 = vrot.lane.b32.xlu1 %v2344_v6, %s2076_s11 }
 0x31b   : > { %1311 = vrot.lane.b32.xlu0 %v2344_v6, %s2077_s12  ;;  %1058 = vrot.lane.b32.xlu1 %v2344_v6, %s2075_s10 }
 0x31f   : > { %1060 = vrot.lane.b32.xlu1 %v1051_v5, %s2075_s10 }
 0x323   : > { %1313 = vrot.lane.b32.xlu1 %v1051_v5, %s2077_s12 }
 0x389   : > { %v1055_v7 = vpop.permute.xlu0 %1054  ;;  %v1053_v8 = vpop.permute.xlu1 %1052 }
 0x38a   : > { %v1056_v9 = vsel %vm256_vm1, %v1053_v8, %v1055_v7  ;;  %v1057_v12 = vsel %vm256_vm1, %v1055_v7, %v1053_v8 }
 0x38b   : > { %1068 = vrot.lane.b32.xlu1 %v1056_v9, %s2077_s12  ;;  %1116 = vmatprep.subr.mxu1 %v1056_v9 }
 0x38d   : > { %v1059_v10 = vpop.permute.xlu1 %1058  ;;  %v1312_v21 = vpop.permute.xlu0 %1311 }
 0x38f   : > { %1074 = vrot.lane.b32.xlu1 %v1056_v9, %s2079_s15 }
 0x391   : > { %v1061_v11 = vpop.permute.xlu1 %1060 }
 0x392   : > { %v2363_v13 = vsel %vm263_vm0, %v1059_v10, %v1061_v11  ;;  %v1063_v16 = vsel %vm263_vm0, %v1061_v11, %v1059_v10 }
 0x393   : > { %1319 = vrot.lane.b32.xlu1 %v1051_v5, %s2079_s15  ;;  %v1064_v17 = vsel %vm256_vm1, %v2363_v13, %v1057_v12  ;;  %v1562_v18 = vsel %vm772_vm3, %v1056_v9, %v1063_v16 }
 0x394   : > { %1066 = vrot.lane.b32.xlu0 %v1064_v17, %s2077_s12  ;;  %1117 = vmatpush1.msra.mxu1 %v1064_v17 }
 0x395   : > { %1940 = vmatmul.mubr.msk.f32.vlgmr.msra.gmra.mxu1 %vm290_vm2, %v1939_v15  ;;  %v1314_v19 = vpop.permute.xlu1 %1313 }
 0x396   : > { %1302 = vmatprep.mubr.f32.mxu1 %v2078_v4  ;;  %v1315_v40 = vsel %vm273_vm9, %v1312_v21, %v1314_v19  ;;  %v1316_v42 = vsel %vm273_vm9, %v1314_v19, %v1312_v21 }
 0x397   : > { %1565 = vrot.lane.b32.xlu1 %v1562_v18, %s2077_s12 }
 0x398   : > { %1072 = vrot.lane.b32.xlu0 %v1064_v17, %s2079_s15 }
 0x39b   : > { %1571 = vrot.lane.b32.xlu1 %v1562_v18, %s2079_s15 }
 0x39c   : > { %1317 = vrot.lane.b32.xlu0 %v2344_v6, %s2079_s15 }
 0x3a0   : > { %1563 = vrot.lane.b32.xlu0 %v2363_v13, %s2077_s12  ;;  %s215_s12 = sand.u32 1, %s2065_s19  }
 0x3a1   : > { %s1842_s23 = scalar_lea.sflag [#allocation3], %s215_s12 }
 0x3a4   : > { %1569 = vrot.lane.b32.xlu0 %v2363_v13, %s2079_s15  ;;  %s1919_s15 = sshll.u32 %s215_s12, 4 }
 0x3a5   : > { %s217_s9 = scalar_lea.vmem [#allocation2], %s1919_s15 }
 0x3a6   : > { %s1856_s13 = sshll.u32 %s217_s9, 4  ;;  %s1857_s13 = int_to_ptr.vmem [resolvable:$true] %s1856_s13 }
 0x3a7   : > { %s2013_s25 = scalar_lea.vmem %s1857_s13, 256  ;;  %p2020_p0 = scmp.lt.s32.totalorder %s1857_s13, %s2018_s26 }
 0x3a8   : > { %1816 = vperm.xlu0 %2008, %v1813_v14   ;;  %p2014_p11 = scmp.ne.s32.totalorder %s1857_s13, %s2013_s25  ;;  %p2021_p1 = scmp.lt.s32.totalorder %s2019_s30, %s2013_s25 }
 0x3aa   : > { %p2015_p12 = pnand %p2014_p11, %p2150_p5  ;;  %p2022_p2 = por %p2021_p1, %p2020_p0 }
 0x3ac   : > { %p2016_p13 = pneg %p2015_p12 }
 0x3ae   : > { %p2023_p3 = pnand %p2022_p2, %p2016_p13 }
 0x3fd   : > { %v1069_v20 = vpop.permute.xlu1 %1068 }
 0x401   : > { %v1075_v22 = vpop.permute.xlu1 %1074 }
 0x405   : > { %v1320_v24 = vpop.permute.xlu1 %1319 }
 0x406   : > { %v1067_v23 = vpop.permute.xlu0 %1066 }
 0x407   : > { %v1070_v30 = vsel %vm273_vm9, %v1067_v23, %v1069_v20  ;;  %v1071_v31 = vsel %vm273_vm9, %v1069_v20, %v1067_v23 }
 0x409   : > { %v1566_v45 = vpop.permute.xlu1 %1565 }
 0x40a   : > { %v1073_v26 = vpop.permute.xlu0 %1072 }
 0x40b   : > { %v1076_v32 = vsel %vm280_vm4, %v1073_v26, %v1075_v22  ;;  %v1077_v33 = vsel %vm280_vm4, %v1075_v22, %v1073_v26 }
 0x40c   : > { %v1079_v34 = vsel %vm2239_vm6, %v1077_v33, %v1070_v30  ;;  %v1232_v35 = vsel %vm2235_vm5, %v1070_v30, %v1077_v33  ;;  %v1078_v36 = vsel %vm2243_vm7, %v1076_v32, %v1071_v31  ;;  %v1231_v37 = vsel %vm2247_vm8, %v1071_v31, %v1076_v32 }
 0x40d   : > { %1190 = vmatprep.subr.mxu0 %v1079_v34  ;;  %1268 = vmatprep.subr.mxu1 %v1232_v35  ;;  %v1572_v54 = vpop.permute.xlu1 %1571 }
 0x40e   : > { %v1318_v41 = vpop.permute.xlu0 %1317  ;;  %1191 = vmatpush1.msra.mxu0 %v1078_v36  ;;  %1269 = vmatpush1.msra.mxu1 %v1231_v37 }
 0x40f   : > { %v1321_v43 = vsel %vm280_vm4, %v1318_v41, %v1320_v24  ;;  %v1322_v44 = vsel %vm280_vm4, %v1320_v24, %v1318_v41  ;;  %1941 = vmatmul.mubr.msk.f32.vlgmr.msra.gmra.mxu0 %vm290_vm2, %v1080_v38  ;;  %1438 = vmatprep.subr.mxu1 %v1051_v5 }
 0x410   : > { %1943 = vmatmul.mubr.msk.f32.vlgmr.msra.gmra.mxu1 %vm290_vm2, %v1942_v39  ;;  %v1324_v46 = vsel %vm2239_vm6, %v1322_v44, %v1315_v40  ;;  %v1323_v47 = vsel %vm2243_vm7, %v1321_v43, %v1316_v42  ;;  %1394 = vmatprep.mubr.f32.mxu0 %v2078_v4  ;;  %v1482_v51 = vsel %vm2235_vm5, %v1315_v40, %v1322_v44 }
 0x411   : > { %1439 = vmatpush1.msra.mxu1 %v2344_v6  ;;  %1360 = vmatprep.subr.mxu0 %v1324_v46  ;;  %v1481_v52 = vsel %vm2247_vm8, %v1316_v42, %v1321_v43 }
 0x412   : > { %v1564_v50 = vpop.permute.xlu0 %1563  ;;  %1361 = vmatpush1.msra.mxu0 %v1323_v47  ;;  %1472 = vmatprep.mubr.f32.mxu1 %v2078_v4 }
 0x413   : > { %1945 = vmatmul.mubr.msk.f32.vlgmr.msra.gmra.mxu0 %vm290_vm2, %v1944_v48  ;;  %1518 = vmatprep.subr.mxu0 %v1482_v51  ;;  %v1567_v56 = vsel %vm273_vm9, %v1564_v50, %v1566_v45  ;;  %v1568_v57 = vsel %vm273_vm9, %v1566_v45, %v1564_v50 }
 0x414   : > { %1519 = vmatpush1.msra.mxu0 %v1481_v52  ;;  %1947 = vmatmul.mubr.msk.f32.vlgmr.msra.gmra.mxu1 %vm290_vm2, %v1946_v49 }
 0x415   : > { %1690 = vmatprep.subr.mxu0 %v1562_v18  ;;  %1552 = vmatprep.mubr.f32.mxu0 %v2078_v4 }
 0x416   : > { %v1570_v55 = vpop.permute.xlu0 %1569  ;;  %1646 = vmatprep.mubr.f32.mxu1 %v2078_v4 }
 0x417   : > { %v1573_v58 = vsel %vm280_vm4, %v1570_v55, %v1572_v54  ;;  %v1574_v59 = vsel %vm280_vm4, %v1572_v54, %v1570_v55  ;;  %1949 = vmatmul.mubr.msk.f32.vlgmr.msra.gmra.mxu0 %vm290_vm2, %v1948_v53 }
 0x418   : > { %1691 = vmatpush1.msra.mxu0 %v2363_v13  ;;  %v1576_v60 = vsel %vm2239_vm6, %v1574_v59, %v1567_v56  ;;  %v1575_v61 = vsel %vm2243_vm7, %v1573_v58, %v1568_v57  ;;  %1724 = vmatprep.mubr.f32.mxu0 %v2078_v4  ;;  %v1734_v63 = vsel %vm2235_vm5, %v1567_v56, %v1574_v59 }
 0x419   : > { %1612 = vmatprep.subr.mxu1 %v1576_v60  ;;  %v1733_v27 = vsel %vm2247_vm8, %v1568_v57, %v1573_v58 }
 0x41a   : > { %1613 = vmatpush1.msra.mxu1 %v1575_v61 }
 0x41b   : > { %1951 = vmatmul.mubr.msk.f32.vlgmr.msra.gmra.mxu1 %vm290_vm2, %v1950_v62  ;;  %1770 = vmatprep.subr.mxu1 %v1734_v63 }
 0x41c   : > { %1771 = vmatpush1.msra.mxu1 %v1733_v27  ;;  %1953 = vmatmul.mubr.msk.f32.vlgmr.msra.gmra.mxu0 %vm290_vm2, %v1952_v3 }
 0x41d   : > { %1804 = vmatprep.mubr.f32.mxu1 %v2078_v4 }
 0x41f   : > { %1955 = vmatmul.mubr.msk.f32.vlgmr.msra.gmra.mxu1 %vm290_vm2, %v1954_v28 }
 0x423   : > { %v1817_v39 = vpop.permute.xlu0 %1816 }
 0x455   : > { %v1152_v2 = vpop.f32.mrf.mxu1 }
 0x457   : > { %v1154_v25 = vpop.f32.mrf.mxu1 }
 0x4cf   : > { %v1226_v5 = vpop.f32.mrf.mxu0 }
 0x4d0   : > { %v1227_v6 = vadd.f32 %v1226_v5, %v1152_v2  ;;  %v1304_v7 = vpop.f32.mrf.mxu1 }
 0x4d1   : > { %v1228_v8 = vpop.f32.mrf.mxu0 }
 0x4d2   : > { %v1229_v9 = vadd.f32 %v1228_v8, %v1154_v25  ;;  %v1309_v29 = vadd.f32 %v1304_v7, %v1227_v6  ;;  %v1306_v10 = vpop.f32.mrf.mxu1 }
 0x4d3   : > { %v1396_v11 = vpop.f32.mrf.mxu0 }
 0x4d4   : > { %v1310_v12 = vadd.f32 %v1306_v10, %v1229_v9  ;;  %v1401_v13 = vadd.f32 %v1396_v11, %v1309_v29  ;;  %v1474_v15 = vpop.f32.mrf.mxu1 }
 0x4d5   : > { %v1398_v16 = vpop.f32.mrf.mxu0 }
 0x4d6   : > { %v1402_v17 = vadd.f32 %v1398_v16, %v1310_v12  ;;  %v1479_v18 = vadd.f32 %v1474_v15, %v1401_v13  ;;  %v1476_v14 = vpop.f32.mrf.mxu1 }
 0x4d7   : > { %v1554_v4 = vpop.f32.mrf.mxu0 }
 0x4d8   : > { %v1480_v19 = vadd.f32 %v1476_v14, %v1402_v17  ;;  %v1559_v21 = vadd.f32 %v1554_v4, %v1479_v18 }
 0x4d9   : > { %v1556_v20 = vpop.f32.mrf.mxu0 }
 0x4da   : > { %v1560_v23 = vadd.f32 %v1556_v20, %v1480_v19 }
 0x4db   : > { %v1648_v22 = vpop.f32.mrf.mxu1 }
 0x4dc   : > { %v1653_v24 = vadd.f32 %v1648_v22, %v1559_v21  ;;  %v1726_v26 = vpop.f32.mrf.mxu0 }
 0x4dd   : > { %v1650_v30 = vpop.f32.mrf.mxu1 }
 0x4de   : > { %v1654_v31 = vadd.f32 %v1650_v30, %v1560_v23  ;;  %v1731_v32 = vadd.f32 %v1726_v26, %v1653_v24  ;;  %v1728_v33 = vpop.f32.mrf.mxu0 }
 0x4df   : > { %v1806_v34 = vpop.f32.mrf.mxu1 }
 0x4e0   : > { %v1732_v35 = vadd.f32 %v1728_v33, %v1654_v31  ;;  %v1811_v36 = vadd.f32 %v1806_v34, %v1731_v32 }
 0x4e1   : > { %v1808_v37 = vpop.f32.mrf.mxu1 }
 0x4e2   : > { %v1812_v38 = vadd.f32 %v1808_v37, %v1732_v35  ;;  %v1819_v40 = vadd.f32 %v1817_v39, %v1811_v36 }
 0x4e4   : > { %v1820_v41 = vadd.f32 %v1817_v39, %v1812_v38 }
 0x4e6   : > { %v1821_v42 = vadd.f32 %v1820_v41, %v1819_v40 }
 0x4e8   : > { %1822 = vadd.xlane.f32.xlu1 %v1821_v42 }
 0x571   : > { %v1823_v43 = vpop.xlane.xlu1 %1822 }
 0x572   : > { %v1824_v44 = vmul.f32 0.00390625, %v1823_v43 }
 0x574   : > { %v1825_v45 = vsub.f32 %v1819_v40, %v1824_v44  ;;  %v1826_v46 = vsub.f32 %v1820_v41, %v1824_v44 }
 0x576   : > { %v1827_v47 = vmul.f32 %v1825_v45, %v1825_v45  ;;  %v1828_v48 = vmul.f32 %v1826_v46, %v1826_v46 }
 0x578   : > { %v1829_v49 = vadd.f32 %v1828_v48, %v1827_v47 }
 0x57a   : > { %1830 = vadd.xlane.f32.xlu0 %v1829_v49 }
 0x603   : > { %v1831_v50 = vpop.xlane.xlu0 %1830 }
 0x604   : > { %v1832_v51 = vmul.f32 0.00390625, %v1831_v50 }
 0x606   : > { %v1833_v52 = vadd.f32 1e-05, %v1832_v51 }
 0x608   : > { %2011 = vrsqrt.f32 %v1833_v52 }
 0x615   : > { %v2012_v53 = vpop.eup %2011 }
 0x616   : > { %v1835_v54 = vmul.f32 %v2012_v53, %v1825_v45  ;;  %v1836_v55 = vmul.f32 %v2012_v53, %v1826_v46 }
 0x618   : > { %v1837_v56 = vadd.f32 %v1835_v54, %v2165_v0  ;;  %v1838_v57 = vadd.f32 %v1836_v55, %v2171_v1 }
 0x61a   : > { %1839 = vst [vmem:[%s217_s9] sm:$0xff] %v1837_v56  ;;  %1840 = vst [vmem:[%s217_s9 + $0x8] sm:$0xff] %v1838_v57 }
 0x61b   : > { %2026 = shalt.err (!%p2023_p3)
}
 0x61c   : > { %s2027_s10 = scalar_lea.hbm %s2486_s17, 256  ;;  %s2031_s7 = scalar_lea.hbm %s2526_s5, 512 }
 0x61d   : > { %p2028_p4 = scmp.ne.s32.totalorder %s2486_s17, %s2027_s10  ;;  %p2032_p9 = scmp.lt.s32.totalorder %s2486_s17, %s2526_s5 }
 0x61e   : > { %p2033_p10 = scmp.lt.s32.totalorder %s2031_s7, %s2027_s10 }
 0x61f   : > { %p2029_p7 = pnand %p2028_p4, %p2150_p5 }
 0x620   : > { %p2034_p11 = por %p2033_p10, %p2032_p9 }
 0x621   : > { %p2030_p8 = pneg %p2029_p7 }
 0x623   : > { %p2035_p12 = pnand %p2034_p11, %p2030_p8 }
 0x625   : > { %2038 = shalt.err (!%p2035_p12)
}
 0x626   : > { %1963 = dma.vmem_to_hbm [thread:$0]  (%p2150_p5), %s1857_s13, 256, %s2486_s17, %s1842_s23  }
 0x627 PF: > { %p1969_p13 = scmp.ge.s32.totalorder %s2073_s21, 2  ;;  %s1868_s8 = sand.u32 1, %s2061_s18  }
 0x628   : > { %s1869_s9 = scalar_lea.sflag [#allocation3], %s1868_s8 }
 0x629   : > { %p1966_p0 = pnand %p1969_p13, %p2154_p6 }
 0x62b   : > { %p1967_p1 = pneg %p1966_p0 }
 0x62d   : > { %2056 = dma.done.wait (%p1967_p1), %s1869_s9, 256  }
 0x62e   : > { %2058 = vsyncadd (%p1967_p1), %s1869_s9, 4294967040  ;;  %p15_p2 = scmp.ge.s32.totalorder %s2137_s24, 4   ;;  %s2537_s18 = smov %s2065_s19 }
 0x62f   : > { %s2538_s19 = smov %s2069_s20  ;;  %s2539_s20 = smov %s2148_s27 }
 0x630   : > { %s2540_s21 = smov %s2137_s24  ;;  %17 = sbr.rel (!%p15_p2) target bundleno = 3 (0x3), region = 91 }
 0x635   :  { %1874 = vsyncpa [#allocation3], 1 }
 0x636   :  { %1876 = vsyncpa [#allocation3 + $0x1], 1 }

</bundles_post_ra>
